<compile_context>
chip_gen: v7x
topology: tpu7x:2x2x1
jax: 0.10.0
libtpu: 0.0.40
codegen_flags: <defaults>
</compile_context>

<pallas_src>
import jax
import jax.numpy as jnp
from jax.experimental import pallas as pl
from jax.experimental.pallas import tpu as pltpu


def _gate_kernel(nw_ref, x_ref, w_ref, nz_ref, probs_ref, meta_ref):
    # nw_ref: SMEM (E,) f32 scalar-prefetch (noise_weight * noisy_std)
    # x_ref : (blk_t, D) f32   token-major input tile
    # w_ref : (E, D)     f32   gate weights (resident)
    # nz_ref: (E, blk_t) f32   pre-sampled noise tile (expert-major, lane-dense)
    # probs_ref: (E, blk_t) f32 ; meta_ref: (4, blk_t) f32
    E = w_ref.shape[0]

    # ---- gate linear, expert-major / lane-dense result: (E, blk_t) ----------
    logits = jax.lax.dot_general(
        w_ref[...], x_ref[...],
        dimension_numbers=(((1,), (1,)), ((), ())),
        preferred_element_type=jnp.float32)

    # ---- unrolled noisy rows + running top-2 (pairwise VPU ops) -------------
    def noisy_row(e):
        return logits[e:e + 1, :] + nw_ref[e] * nz_ref[pl.ds(e, 1), :]

    m1 = noisy_row(0)                                   # (1, blk_t)
    i1 = jnp.zeros(m1.shape, jnp.int32)
    m2 = jnp.full(m1.shape, -jnp.inf, jnp.float32)
    i2 = jnp.zeros(m1.shape, jnp.int32)
    for e in range(1, E):
        row = noisy_row(e)
        gt1 = row > m1            # strict > : first occurrence wins (lax.top_k)
        gt2 = row > m2
        i2 = jnp.where(gt1, i1, jnp.where(gt2, e, i2))
        m2 = jnp.where(gt1, m1, jnp.where(gt2, row, m2))
        i1 = jnp.where(gt1, e, i1)
        m1 = jnp.where(gt1, row, m1)

    # ---- closed-form top-2 softmax (m2 <= m1) --------------------------------
    e2 = jnp.exp(m2 - m1)                               # (1, blk_t)
    p2 = e2 / (1.0 + e2)
    p1 = 1.0 - p2

    # ---- scatter probabilities into lane-dense expert rows -------------------
    for e in range(E):
        probs_ref[pl.ds(e, 1), :] = jnp.where(
            i1 == e, p1, jnp.where(i2 == e, p2, 0.0))

    # ---- meta: [val1, val2, bitcast(idx1), bitcast(idx2)] as dense rows ------
    meta_ref[pl.ds(0, 1), :] = m1
    meta_ref[pl.ds(1, 1), :] = m2
    meta_ref[pl.ds(2, 1), :] = pltpu.bitcast(i1, jnp.float32)
    meta_ref[pl.ds(3, 1), :] = pltpu.bitcast(i2, jnp.float32)


def topk_moe_gate(x, gate_w, noise_w, noise_et, *, top_k=2, noisy_std=1.0,
                  tile_t=8192):
    """x: (B, S, D); gate_w: (E, D) [torch Linear layout]; noise_w: (E,);
    noise_et: (E, B*S) pre-sampled standard normal in expert-major layout
    (glue for torch.randn_like, lane-dense for the kernel)."""
    assert top_k == 2, "kernel implements the module's top_k = 2"
    B, S, D = x.shape
    E = gate_w.shape[0]
    T = B * S

    x2 = x.reshape(T, D).astype(jnp.float32)                # (T, D)
    nz = noise_et.astype(jnp.float32)                       # (E, T)
    w = gate_w.astype(jnp.float32)                          # (E, D)
    nw = noise_w.astype(jnp.float32) * float(noisy_std)     # (E,) -> SMEM

    # tile_t is a multiple of 128; when T <= tile_t the single block equals
    # the full array dims, otherwise Pallas handles the partial last block.
    blk_t = T if T <= tile_t else tile_t
    grid = (pl.cdiv(T, blk_t),)

    grid_spec = pltpu.PrefetchScalarGridSpec(
        num_scalar_prefetch=1,
        grid=grid,
        in_specs=[
            pl.BlockSpec((blk_t, D), lambda i, nw_sref: (i, 0)),   # x (streamed)
            pl.BlockSpec((E, D), lambda i, nw_sref: (0, 0)),       # W (resident)
            pl.BlockSpec((E, blk_t), lambda i, nw_sref: (0, i)),   # noise (streamed)
        ],
        out_specs=[
            pl.BlockSpec((E, blk_t), lambda i, nw_sref: (0, i)),          # probs
            pl.BlockSpec((2 * top_k, blk_t), lambda i, nw_sref: (0, i)),  # meta
        ],
    )

    probs_et, meta = pl.pallas_call(
        _gate_kernel,
        grid_spec=grid_spec,
        out_shape=[
            jax.ShapeDtypeStruct((E, T), jnp.float32),
            jax.ShapeDtypeStruct((2 * top_k, T), jnp.float32),
        ],
        compiler_params=pltpu.CompilerParams(
            dimension_semantics=("parallel",)),
    )(nw, x2, w, nz)

    # Expert-major -> module's token-major shapes (tiny arrays; downstream
    # dispatch could consume the expert-major layout directly instead).
    probs = probs_et.T.reshape(B, S, E)
    vals = meta[:top_k, :].T.reshape(B, S, top_k)
    idx = jax.lax.bitcast_convert_type(meta[top_k:, :],
                                       jnp.int32).T.reshape(B, S, top_k)
    return probs, idx, vals


def _reference(x, gate_w, noise_w, noise, top_k=2, noisy_std=1.0):
    logits = jnp.einsum("bsd,ed->bse", x, gate_w)
    logits_noisy = logits + noise * noisy_std * noise_w
    vals, idx = jax.lax.top_k(logits_noisy, top_k)
    E = gate_w.shape[0]
    col = jnp.arange(E)
    in_topk = ((col[None, None, :] == idx[..., 0:1]) |
               (col[None, None, :] == idx[..., 1:2]))
    sparse = jnp.where(in_topk, logits_noisy, -jnp.inf)
    probs = jax.nn.softmax(sparse, axis=-1)
    return probs, idx, vals


if __name__ == "__main__":
    # GPTConfig: n_embd=8, num_experts=5, k=2; mh_output-style shapes.
    batch_size, seq_len, n_embd, num_experts, top_k = 3, 7, 8, 5, 2
    noisy_std = 1.0

    key = jax.random.PRNGKey(0)
    kx, kw, knw, kn = jax.random.split(key, 4)

    x = jax.random.normal(kx, (batch_size, seq_len, n_embd), dtype=jnp.float32)

    # nn.Linear(n_embd, num_experts, bias=False) default init: U(-1/sqrt(D), 1/sqrt(D))
    bound = 1.0 / (n_embd ** 0.5)
    gate_w = jax.random.uniform(kw, (num_experts, n_embd), jnp.float32,
                                minval=-bound, maxval=bound)
    # noise_weight is zero-init in the module; use a small nonzero value so
    # the noisy path is actually exercised by the check.
    noise_w = 0.1 * jax.random.normal(knw, (num_experts,), jnp.float32)
    # randn_like(logits): sampled in plain-JAX glue, expert-major for the kernel.
    noise_et = jax.random.normal(kn, (num_experts, batch_size * seq_len),
                                 jnp.float32)

    probs, idx, vals = topk_moe_gate(x, gate_w, noise_w, noise_et,
                                     top_k=top_k, noisy_std=noisy_std)
    jax.block_until_ready((probs, idx, vals))

    noise_bse = noise_et.T.reshape(batch_size, seq_len, num_experts)
    r_probs, r_idx, r_vals = _reference(x, gate_w, noise_w, noise_bse,
                                        top_k, noisy_std)
    assert jnp.allclose(probs, r_probs, atol=1e-5), "probs mismatch"
    assert jnp.allclose(vals, r_vals, atol=1e-5), "topk values mismatch"
    assert jnp.all(idx == r_idx), "topk indices mismatch"
    assert jnp.allclose(jnp.sum(probs, axis=-1), 1.0, atol=1e-5)

    print("KERNEL_OK")
</pallas_src>

<mosaic_0001>
module attributes {stable_mosaic.version = 11 : i64} {
  func.func @_gate_kernel(%arg0: i32, %arg1: memref<5xf32, #tpu.memory_space<smem>>, %arg2: memref<21x8xf32, #tpu.memory_space<vmem>>, %arg3: memref<5x8xf32, #tpu.memory_space<vmem>>, %arg4: memref<5x21xf32, #tpu.memory_space<vmem>>, %arg5: memref<5x21xf32, #tpu.memory_space<vmem>>, %arg6: memref<4x21xf32, #tpu.memory_space<vmem>>) attributes {dimension_semantics = [#tpu.dimension_semantics<parallel>], iteration_bounds = array<i64: 1>, scalar_prefetch = 1 : i64, scratch_operands = 0 : i64, tpu.core_type = #tpu.core_type<tc>, window_params = [{transform_indices = @transform_0, window_bounds = array<i64: 21, 8>}, {pipeline_mode = #tpu.pipeline_mode<synchronous>, transform_indices = @transform_1, window_bounds = array<i64: 5, 8>}, {transform_indices = @transform_2, window_bounds = array<i64: 5, 21>}, {transform_indices = @transform_3, window_bounds = array<i64: 5, 21>}, {transform_indices = @transform_4, window_bounds = array<i64: 4, 21>}]} {
    %c0 = arith.constant 0 : index
    %c0_0 = arith.constant 0 : index
    %0 = vector.load %arg3[%c0, %c0_0] : memref<5x8xf32, #tpu.memory_space<vmem>>, vector<5x8xf32>
    %c0_1 = arith.constant 0 : index
    %c0_2 = arith.constant 0 : index
    %1 = vector.load %arg2[%c0_1, %c0_2] : memref<21x8xf32, #tpu.memory_space<vmem>>, vector<21x8xf32>
    %cst = arith.constant dense<0.000000e+00> : vector<5x21xf32>
    %2 = tpu.matmul %0, %1, %cst {dimension_numbers = #tpu.dot_dimension_numbers<[1], [1], [0], [0], [0, 0, 1, 0], [], []>} : vector<5x8xf32>, vector<21x8xf32>, vector<5x21xf32> -> vector<5x21xf32>
    %3 = vector.extract_strided_slice %2 {offsets = [0, 0], sizes = [1, 21], strides = [1, 1]} : vector<5x21xf32> to vector<1x21xf32>
    %c0_3 = arith.constant 0 : index
    %4 = memref.load %arg1[%c0_3] : memref<5xf32, #tpu.memory_space<smem>>
    %c0_4 = arith.constant 0 : index
    %c0_5 = arith.constant 0 : index
    %5 = vector.load %arg4[%c0_4, %c0_5] : memref<5x21xf32, #tpu.memory_space<vmem>>, vector<1x21xf32>
    %6 = vector.broadcast %4 : f32 to vector<1x21xf32>
    %7 = arith.mulf %6, %5 : vector<1x21xf32>
    %8 = arith.addf %3, %7 : vector<1x21xf32>
    %c0_i32 = arith.constant 0 : i32
    %9 = vector.broadcast %c0_i32 : i32 to vector<1x21xi32>
    %cst_6 = arith.constant 0xFF800000 : f32
    %10 = vector.broadcast %cst_6 : f32 to vector<1x21xf32>
    %c0_i32_7 = arith.constant 0 : i32
    %11 = vector.broadcast %c0_i32_7 : i32 to vector<1x21xi32>
    %12 = vector.extract_strided_slice %2 {offsets = [1, 0], sizes = [1, 21], strides = [1, 1]} : vector<5x21xf32> to vector<1x21xf32>
    %c1 = arith.constant 1 : index
    %13 = memref.load %arg1[%c1] : memref<5xf32, #tpu.memory_space<smem>>
    %c1_8 = arith.constant 1 : index
    %c0_9 = arith.constant 0 : index
    %14 = vector.load %arg4[%c1_8, %c0_9] : memref<5x21xf32, #tpu.memory_space<vmem>>, vector<1x21xf32>
    %15 = vector.broadcast %13 : f32 to vector<1x21xf32>
    %16 = arith.mulf %15, %14 : vector<1x21xf32>
    %17 = arith.addf %12, %16 : vector<1x21xf32>
    %18 = arith.cmpf ogt, %17, %8 : vector<1x21xf32>
    %19 = arith.cmpf ogt, %17, %10 : vector<1x21xf32>
    %c1_i32 = arith.constant 1 : i32
    %20 = vector.broadcast %c1_i32 : i32 to vector<1x21xi32>
    %21 = arith.select %19, %20, %11 : vector<1x21xi1>, vector<1x21xi32>
    %22 = arith.select %18, %9, %21 : vector<1x21xi1>, vector<1x21xi32>
    %23 = arith.select %19, %17, %10 : vector<1x21xi1>, vector<1x21xf32>
    %24 = arith.select %18, %8, %23 : vector<1x21xi1>, vector<1x21xf32>
    %c1_i32_10 = arith.constant 1 : i32
    %25 = vector.broadcast %c1_i32_10 : i32 to vector<1x21xi32>
    %26 = arith.select %18, %25, %9 : vector<1x21xi1>, vector<1x21xi32>
    %27 = arith.select %18, %17, %8 : vector<1x21xi1>, vector<1x21xf32>
    %28 = vector.extract_strided_slice %2 {offsets = [2, 0], sizes = [1, 21], strides = [1, 1]} : vector<5x21xf32> to vector<1x21xf32>
    %c2 = arith.constant 2 : index
    %29 = memref.load %arg1[%c2] : memref<5xf32, #tpu.memory_space<smem>>
    %c2_11 = arith.constant 2 : index
    %c0_12 = arith.constant 0 : index
    %30 = vector.load %arg4[%c2_11, %c0_12] : memref<5x21xf32, #tpu.memory_space<vmem>>, vector<1x21xf32>
    %31 = vector.broadcast %29 : f32 to vector<1x21xf32>
    %32 = arith.mulf %31, %30 : vector<1x21xf32>
    %33 = arith.addf %28, %32 : vector<1x21xf32>
    %34 = arith.cmpf ogt, %33, %27 : vector<1x21xf32>
    %35 = arith.cmpf ogt, %33, %24 : vector<1x21xf32>
    %c2_i32 = arith.constant 2 : i32
    %36 = vector.broadcast %c2_i32 : i32 to vector<1x21xi32>
    %37 = arith.select %35, %36, %22 : vector<1x21xi1>, vector<1x21xi32>
    %38 = arith.select %34, %26, %37 : vector<1x21xi1>, vector<1x21xi32>
    %39 = arith.select %35, %33, %24 : vector<1x21xi1>, vector<1x21xf32>
    %40 = arith.select %34, %27, %39 : vector<1x21xi1>, vector<1x21xf32>
    %c2_i32_13 = arith.constant 2 : i32
    %41 = vector.broadcast %c2_i32_13 : i32 to vector<1x21xi32>
    %42 = arith.select %34, %41, %26 : vector<1x21xi1>, vector<1x21xi32>
    %43 = arith.select %34, %33, %27 : vector<1x21xi1>, vector<1x21xf32>
    %44 = vector.extract_strided_slice %2 {offsets = [3, 0], sizes = [1, 21], strides = [1, 1]} : vector<5x21xf32> to vector<1x21xf32>
    %c3 = arith.constant 3 : index
    %45 = memref.load %arg1[%c3] : memref<5xf32, #tpu.memory_space<smem>>
    %c3_14 = arith.constant 3 : index
    %c0_15 = arith.constant 0 : index
    %46 = vector.load %arg4[%c3_14, %c0_15] : memref<5x21xf32, #tpu.memory_space<vmem>>, vector<1x21xf32>
    %47 = vector.broadcast %45 : f32 to vector<1x21xf32>
    %48 = arith.mulf %47, %46 : vector<1x21xf32>
    %49 = arith.addf %44, %48 : vector<1x21xf32>
    %50 = arith.cmpf ogt, %49, %43 : vector<1x21xf32>
    %51 = arith.cmpf ogt, %49, %40 : vector<1x21xf32>
    %c3_i32 = arith.constant 3 : i32
    %52 = vector.broadcast %c3_i32 : i32 to vector<1x21xi32>
    %53 = arith.select %51, %52, %38 : vector<1x21xi1>, vector<1x21xi32>
    %54 = arith.select %50, %42, %53 : vector<1x21xi1>, vector<1x21xi32>
    %55 = arith.select %51, %49, %40 : vector<1x21xi1>, vector<1x21xf32>
    %56 = arith.select %50, %43, %55 : vector<1x21xi1>, vector<1x21xf32>
    %c3_i32_16 = arith.constant 3 : i32
    %57 = vector.broadcast %c3_i32_16 : i32 to vector<1x21xi32>
    %58 = arith.select %50, %57, %42 : vector<1x21xi1>, vector<1x21xi32>
    %59 = arith.select %50, %49, %43 : vector<1x21xi1>, vector<1x21xf32>
    %60 = vector.extract_strided_slice %2 {offsets = [4, 0], sizes = [1, 21], strides = [1, 1]} : vector<5x21xf32> to vector<1x21xf32>
    %c4 = arith.constant 4 : index
    %61 = memref.load %arg1[%c4] : memref<5xf32, #tpu.memory_space<smem>>
    %c4_17 = arith.constant 4 : index
    %c0_18 = arith.constant 0 : index
    %62 = vector.load %arg4[%c4_17, %c0_18] : memref<5x21xf32, #tpu.memory_space<vmem>>, vector<1x21xf32>
    %63 = vector.broadcast %61 : f32 to vector<1x21xf32>
    %64 = arith.mulf %63, %62 : vector<1x21xf32>
    %65 = arith.addf %60, %64 : vector<1x21xf32>
    %66 = arith.cmpf ogt, %65, %59 : vector<1x21xf32>
    %67 = arith.cmpf ogt, %65, %56 : vector<1x21xf32>
    %c4_i32 = arith.constant 4 : i32
    %68 = vector.broadcast %c4_i32 : i32 to vector<1x21xi32>
    %69 = arith.select %67, %68, %54 : vector<1x21xi1>, vector<1x21xi32>
    %70 = arith.select %66, %58, %69 : vector<1x21xi1>, vector<1x21xi32>
    %71 = arith.select %67, %65, %56 : vector<1x21xi1>, vector<1x21xf32>
    %72 = arith.select %66, %59, %71 : vector<1x21xi1>, vector<1x21xf32>
    %c4_i32_19 = arith.constant 4 : i32
    %73 = vector.broadcast %c4_i32_19 : i32 to vector<1x21xi32>
    %74 = arith.select %66, %73, %58 : vector<1x21xi1>, vector<1x21xi32>
    %75 = arith.select %66, %65, %59 : vector<1x21xi1>, vector<1x21xf32>
    %76 = arith.subf %72, %75 : vector<1x21xf32>
    %77 = math.exp %76 : vector<1x21xf32>
    %cst_20 = arith.constant 1.000000e+00 : f32
    %78 = vector.broadcast %cst_20 : f32 to vector<1x21xf32>
    %79 = arith.addf %78, %77 : vector<1x21xf32>
    %80 = arith.divf %77, %79 : vector<1x21xf32>
    %cst_21 = arith.constant 1.000000e+00 : f32
    %81 = vector.broadcast %cst_21 : f32 to vector<1x21xf32>
    %82 = arith.subf %81, %80 : vector<1x21xf32>
    %c0_i32_22 = arith.constant 0 : i32
    %83 = vector.broadcast %c0_i32_22 : i32 to vector<1x21xi32>
    %84 = arith.cmpi eq, %74, %83 : vector<1x21xi32>
    %c0_i32_23 = arith.constant 0 : i32
    %85 = vector.broadcast %c0_i32_23 : i32 to vector<1x21xi32>
    %86 = arith.cmpi eq, %70, %85 : vector<1x21xi32>
    %cst_24 = arith.constant 0.000000e+00 : f32
    %87 = vector.broadcast %cst_24 : f32 to vector<1x21xf32>
    %88 = arith.select %86, %80, %87 : vector<1x21xi1>, vector<1x21xf32>
    %89 = arith.select %84, %82, %88 : vector<1x21xi1>, vector<1x21xf32>
    %c0_25 = arith.constant 0 : index
    %c0_26 = arith.constant 0 : index
    %90 = vector.load %arg5[%c0_25, %c0_26] : memref<5x21xf32, #tpu.memory_space<vmem>>, vector<1x21xf32>
    tpu.vector_store %arg5[%c0_25, %c0_26], %89 {strides = array<i32>} : memref<5x21xf32, #tpu.memory_space<vmem>>, vector<1x21xf32>,
    %c1_i32_27 = arith.constant 1 : i32
    %91 = vector.broadcast %c1_i32_27 : i32 to vector<1x21xi32>
    %92 = arith.cmpi eq, %74, %91 : vector<1x21xi32>
    %c1_i32_28 = arith.constant 1 : i32
    %93 = vector.broadcast %c1_i32_28 : i32 to vector<1x21xi32>
    %94 = arith.cmpi eq, %70, %93 : vector<1x21xi32>
    %cst_29 = arith.constant 0.000000e+00 : f32
    %95 = vector.broadcast %cst_29 : f32 to vector<1x21xf32>
    %96 = arith.select %94, %80, %95 : vector<1x21xi1>, vector<1x21xf32>
    %97 = arith.select %92, %82, %96 : vector<1x21xi1>, vector<1x21xf32>
    %c1_30 = arith.constant 1 : index
    %c0_31 = arith.constant 0 : index
    %98 = vector.load %arg5[%c1_30, %c0_31] : memref<5x21xf32, #tpu.memory_space<vmem>>, vector<1x21xf32>
    tpu.vector_store %arg5[%c1_30, %c0_31], %97 {strides = array<i32>} : memref<5x21xf32, #tpu.memory_space<vmem>>, vector<1x21xf32>,
    %c2_i32_32 = arith.constant 2 : i32
    %99 = vector.broadcast %c2_i32_32 : i32 to vector<1x21xi32>
    %100 = arith.cmpi eq, %74, %99 : vector<1x21xi32>
    %c2_i32_33 = arith.constant 2 : i32
    %101 = vector.broadcast %c2_i32_33 : i32 to vector<1x21xi32>
    %102 = arith.cmpi eq, %70, %101 : vector<1x21xi32>
    %cst_34 = arith.constant 0.000000e+00 : f32
    %103 = vector.broadcast %cst_34 : f32 to vector<1x21xf32>
    %104 = arith.select %102, %80, %103 : vector<1x21xi1>, vector<1x21xf32>
    %105 = arith.select %100, %82, %104 : vector<1x21xi1>, vector<1x21xf32>
    %c2_35 = arith.constant 2 : index
    %c0_36 = arith.constant 0 : index
    %106 = vector.load %arg5[%c2_35, %c0_36] : memref<5x21xf32, #tpu.memory_space<vmem>>, vector<1x21xf32>
    tpu.vector_store %arg5[%c2_35, %c0_36], %105 {strides = array<i32>} : memref<5x21xf32, #tpu.memory_space<vmem>>, vector<1x21xf32>,
    %c3_i32_37 = arith.constant 3 : i32
    %107 = vector.broadcast %c3_i32_37 : i32 to vector<1x21xi32>
    %108 = arith.cmpi eq, %74, %107 : vector<1x21xi32>
    %c3_i32_38 = arith.constant 3 : i32
    %109 = vector.broadcast %c3_i32_38 : i32 to vector<1x21xi32>
    %110 = arith.cmpi eq, %70, %109 : vector<1x21xi32>
    %cst_39 = arith.constant 0.000000e+00 : f32
    %111 = vector.broadcast %cst_39 : f32 to vector<1x21xf32>
    %112 = arith.select %110, %80, %111 : vector<1x21xi1>, vector<1x21xf32>
    %113 = arith.select %108, %82, %112 : vector<1x21xi1>, vector<1x21xf32>
    %c3_40 = arith.constant 3 : index
    %c0_41 = arith.constant 0 : index
    %114 = vector.load %arg5[%c3_40, %c0_41] : memref<5x21xf32, #tpu.memory_space<vmem>>, vector<1x21xf32>
    tpu.vector_store %arg5[%c3_40, %c0_41], %113 {strides = array<i32>} : memref<5x21xf32, #tpu.memory_space<vmem>>, vector<1x21xf32>,
    %c4_i32_42 = arith.constant 4 : i32
    %115 = vector.broadcast %c4_i32_42 : i32 to vector<1x21xi32>
    %116 = arith.cmpi eq, %74, %115 : vector<1x21xi32>
    %c4_i32_43 = arith.constant 4 : i32
    %117 = vector.broadcast %c4_i32_43 : i32 to vector<1x21xi32>
    %118 = arith.cmpi eq, %70, %117 : vector<1x21xi32>
    %cst_44 = arith.constant 0.000000e+00 : f32
    %119 = vector.broadcast %cst_44 : f32 to vector<1x21xf32>
    %120 = arith.select %118, %80, %119 : vector<1x21xi1>, vector<1x21xf32>
    %121 = arith.select %116, %82, %120 : vector<1x21xi1>, vector<1x21xf32>
    %c4_45 = arith.constant 4 : index
    %c0_46 = arith.constant 0 : index
    %122 = vector.load %arg5[%c4_45, %c0_46] : memref<5x21xf32, #tpu.memory_space<vmem>>, vector<1x21xf32>
    tpu.vector_store %arg5[%c4_45, %c0_46], %121 {strides = array<i32>} : memref<5x21xf32, #tpu.memory_space<vmem>>, vector<1x21xf32>,
    %c0_47 = arith.constant 0 : index
    %c0_48 = arith.constant 0 : index
    %123 = vector.load %arg6[%c0_47, %c0_48] : memref<4x21xf32, #tpu.memory_space<vmem>>, vector<1x21xf32>
    tpu.vector_store %arg6[%c0_47, %c0_48], %75 {strides = array<i32>} : memref<4x21xf32, #tpu.memory_space<vmem>>, vector<1x21xf32>,
    %c1_49 = arith.constant 1 : index
    %c0_50 = arith.constant 0 : index
    %124 = vector.load %arg6[%c1_49, %c0_50] : memref<4x21xf32, #tpu.memory_space<vmem>>, vector<1x21xf32>
    tpu.vector_store %arg6[%c1_49, %c0_50], %72 {strides = array<i32>} : memref<4x21xf32, #tpu.memory_space<vmem>>, vector<1x21xf32>,
    %125 = tpu.bitcast %74 : vector<1x21xi32> -> vector<1x21xf32>
    %c2_51 = arith.constant 2 : index
    %c0_52 = arith.constant 0 : index
    %126 = vector.load %arg6[%c2_51, %c0_52] : memref<4x21xf32, #tpu.memory_space<vmem>>, vector<1x21xf32>
    tpu.vector_store %arg6[%c2_51, %c0_52], %125 {strides = array<i32>} : memref<4x21xf32, #tpu.memory_space<vmem>>, vector<1x21xf32>,
    %127 = tpu.bitcast %70 : vector<1x21xi32> -> vector<1x21xf32>
    %c3_53 = arith.constant 3 : index
    %c0_54 = arith.constant 0 : index
    %128 = vector.load %arg6[%c3_53, %c0_54] : memref<4x21xf32, #tpu.memory_space<vmem>>, vector<1x21xf32>
    tpu.vector_store %arg6[%c3_53, %c0_54], %127 {strides = array<i32>} : memref<4x21xf32, #tpu.memory_space<vmem>>, vector<1x21xf32>,
    return
  }
  func.func @transform_0(%arg0: i32, %arg1: memref<5xf32, #tpu.memory_space<smem>>) -> (i32, i32) {
    %c0_i32 = arith.constant 0 : i32
    %c0_i32_0 = arith.constant 0 : i32
    return %arg0, %c0_i32 : i32, i32
  }
  func.func @transform_1(%arg0: i32, %arg1: memref<5xf32, #tpu.memory_space<smem>>) -> (i32, i32) {
    %c0_i32 = arith.constant 0 : i32
    %c0_i32_0 = arith.constant 0 : i32
    %c0_i32_1 = arith.constant 0 : i32
    return %c0_i32, %c0_i32_0 : i32, i32
  }
  func.func @transform_2(%arg0: i32, %arg1: memref<5xf32, #tpu.memory_space<smem>>) -> (i32, i32) {
    %c0_i32 = arith.constant 0 : i32
    %c0_i32_0 = arith.constant 0 : i32
    return %c0_i32, %arg0 : i32, i32
  }
  func.func @transform_3(%arg0: i32, %arg1: memref<5xf32, #tpu.memory_space<smem>>) -> (i32, i32) {
    %c0_i32 = arith.constant 0 : i32
    %c0_i32_0 = arith.constant 0 : i32
    return %c0_i32, %arg0 : i32, i32
  }
  func.func @transform_4(%arg0: i32, %arg1: memref<5xf32, #tpu.memory_space<smem>>) -> (i32, i32) {
    %c0_i32 = arith.constant 0 : i32
    %c0_i32_0 = arith.constant 0 : i32
    return %c0_i32, %arg0 : i32, i32
  }
}

</mosaic_0001>

<bundles_post_ra>
// kernel: tpu_custom_call.1
= control target key start
LH: loop header
LB: loop body
LE: loop exit
PB: predicated region body
PF: predicated region fallthrough
CT: control target
= control target key end

     0   :  { %s476_s0 = inlined_call_operand.vmem [shape: f32[5], index: 0, kind: input, shape index: {}]   ;;  %s477_s1 = inlined_call_operand.vmem [shape: f32[21,8], index: 1, kind: input, shape index: {}]   ;;  %s478_s2 = inlined_call_operand.vmem [shape: f32[5,8], index: 2, kind: input, shape index: {}]   ;;  %s479_s3 = inlined_call_operand.vmem [shape: f32[5,21], index: 3, kind: input, shape index: {}]   ;;  %s480_s4 = inlined_call_operand.hbm [shape: f32[5,21], index: 4, kind: output, shape index: {0}]   ;;  %s481_s5 = inlined_call_operand.hbm [shape: f32[4,21], index: 5, kind: output, shape index: {1}]  }
   0x1   :  { %s11_s20 = sshll.u32 %s476_s0, 4  ;;  %s12_s20 = int_to_ptr.vmem [resolvable:$true] %s11_s20 }
   0x2   :  { %s311_s21 = scalar_lea.vmem %s12_s20, 16  ;;  %p316_p1 = scmp.lt.s32.totalorder %s12_s20, %s12_s20 }
   0x3   :  { %p312_p0 = scmp.ne.s32.totalorder %s12_s20, %s311_s21  ;;  %p317_p2 = scmp.lt.s32.totalorder %s311_s21, %s311_s21 }
   0x5   :  { %p318_p3 = por %p317_p2, %p316_p1 }
   0x7   :  { %p319_p4 = pnand %p318_p3, %p312_p0 }
   0x9   :  { %322 = shalt.err (!%p319_p4)  }
   0xa   :  { %s373_s22 = smov [#allocation3]  }
   0xb   :  { %14 = dma.vmem_to_smem %s12_s20, 16, %s373_s22, [#allocation2] }
   0xc   :  { %367 = dma.done.wait [#allocation2], 16 }
   0xd   :  { %368 = vsyncadd [#allocation2], 4294967280 }
   0xe   :  { %16 = sfence }
   0xf   :  { %17 = vsyncpa [#allocation5], 0  ;;  %v26_v0 = vld [vmem:[%s477_s1] sm:$0xff]  ;;  %v27_v1 = vld [vmem:[%s477_s1 + $0x8] sm:$0xff]  ;;  %vm29_vm0 = vcmask 64512   ;;  %v374_v2 = vmov 0.0|0.0  }
  0x10   :  { %296 = vmatprep.subr.bf16.mxu0 %v374_v2  ;;  %v297_v3 = vpack.c.bf16 %v27_v1, %v26_v0  ;;  %vm298_vm1 = vmpackc.low %vm29_vm0, %vm29_vm0  ;;  %vm375_vm2 = vmmov 0   ;;  %v376_v4 = vmov 0.0  }
  0x11   :  { %293 = vmatprep.mubr.msk.f32.mxu0 %vm375_vm2, %v376_v4 }
  0x12   :  { %18 = vsyncpa [#allocation7], 0  ;;  %299 = vmatpush3.bf16.xpose.msk.msra.mxu0 %vm298_vm1, %v297_v3  ;;  %v28_v5 = vld [vmem:[%s477_s1 + $0x10] sm:$0x1f]  ;;  %v25_v6 = vld [vmem:[%s478_s2] sm:$0x1f] }
  0x13   :  { %291 = vmatprep.subr.mxu0 %v376_v4  ;;  %s279_s30 = sld [smem:[#allocation3 + $0x1]]  ;;  %s112_s6 = sld [smem:[#allocation3]]  ;;  %v118_v7 = vld [vmem:[%s479_s3 + $0x1] sm:$0x1]  ;;  %v113_v10 = vld [vmem:[%s479_s3] sm:$0x1] }
  0x14   :  { %s280_s7 = sld [smem:[#allocation3 + $0x2]]  ;;  %s281_s8 = sld [smem:[#allocation3 + $0x3]]  ;;  %v137_v12 = vld [vmem:[%s479_s3 + $0x2] sm:$0x1]  ;;  %v161_v17 = vld [vmem:[%s479_s3 + $0x3] sm:$0x1] }
  0x15   :  { %s282_s2 = sld [smem:[#allocation3 + $0x4]]  ;;  %v185_v25 = vld [vmem:[%s479_s3 + $0x4] sm:$0x1]  ;;  %v377_v28 = vmov 0   ;;  %vm219_vm9 = vcmask 167940   ;;  %s378_s3 = smov [#allocation6]  }
  0x16   :  { %s263_s18 = sshll.u32 %s378_s3, 4  ;;  %s264_s18 = int_to_ptr.vmem [resolvable:$true] %s263_s18 }
  0x17   :  { %s323_s19 = scalar_lea.vmem %s264_s18, 64  ;;  %p328_p6 = scmp.lt.s32.totalorder %s264_s18, %s264_s18 }
  0x18   :  { %p324_p5 = scmp.ne.s32.totalorder %s264_s18, %s323_s19  ;;  %p329_p7 = scmp.lt.s32.totalorder %s323_s19, %s323_s19 }
  0x19   :  { %v119_v8 = vstv %s279_s30  ;;  %v114_v11 = vstv %s112_s6 }
  0x1a   :  { %292 = vmatpush3.xpose.msk.msra.mxu0 %vm29_vm0, %v28_v5  ;;  %v120_v9 = vmul.f32 %v119_v8, %v118_v7  ;;  %v138_v13 = vstv %s280_s7  ;;  %v115_v14 = vmul.f32 %v114_v11, %v113_v10  ;;  %v162_v18 = vstv %s281_s8  ;;  %p330_p8 = por %p329_p7, %p328_p6 }
  0x1b   :  { %v139_v16 = vmul.f32 %v138_v13, %v137_v12  ;;  %v163_v20 = vmul.f32 %v162_v18, %v161_v17  ;;  %v186_v26 = vstv %s282_s2 }
  0x1c   :  { %v122_v15 = vrot.slane %v120_v9, 7  ;;  %v187_v33 = vmul.f32 %v186_v26, %v185_v25  ;;  %p331_p9 = pnand %p330_p8, %p324_p5 }
  0x1d   :  { %294 = vmatmul.mubr.msk.f32.vlgmr.msra.gmra.mrb[0].mxu0 %vm29_vm0, %v25_v6  ;;  %v141_v23 = vrot.slane %v139_v16, 6  ;;  %v165_v32 = vrot.slane %v163_v20, 5 }
  0x1e   :  { %v189_v43 = vrot.slane %v187_v33, 4 }
  0xf0   :  { %v108_v19 = vpop.f32.mrb[0].mxu0 }
  0xf1   :  { %v116_v21 = vadd.f32 %v115_v14, %v108_v19  ;;  %v124_v22 = vadd.f32 %v122_v15, %v108_v19  ;;  %v295_v24 = vpop.f32.mrb[1].mxu0  ;;  %v143_v31 = vadd.f32 %v141_v23, %v108_v19  ;;  %v167_v42 = vadd.f32 %v165_v32, %v108_v19 }
  0xf2   :  { %v191_v56 = vadd.f32 %v189_v43, %v108_v19 }
  0xf3   :  { %v126_v27 = vrot.slane %v116_v21, 7  ;;  %vm129_vm3 = vcmp.gt.f32.partialorder %v124_v22, -inf }
  0xf4   :  { %v130_v29 = vsel %vm129_vm3, 1, %v377_v28  ;;  %v132_v30 = vsel %vm129_vm3, %v124_v22, -inf }
  0xf5   :  { %vm128_vm4 = vcmp.gt.f32.partialorder %v124_v22, %v126_v27 }
  0xf6   :  { %v131_v34 = vsel %vm128_vm4, 0, %v130_v29  ;;  %v133_v35 = vsel %vm128_vm4, %v126_v27, %v132_v30  ;;  %v134_v36 = vsel %vm128_vm4, 1, %v377_v28  ;;  %v135_v37 = vsel %vm128_vm4, %v124_v22, %v126_v27 }
  0xf7   :  { %v145_v38 = vrot.slane %v135_v37, 7  ;;  %v149_v39 = vrot.slane %v133_v35, 7  ;;  %v152_v40 = vrot.slane %v131_v34, 7  ;;  %v154_v41 = vrot.slane %v134_v36, 7 }
  0xf9   :  { %vm147_vm5 = vcmp.gt.f32.partialorder %v143_v31, %v145_v38  ;;  %vm151_vm6 = vcmp.gt.f32.partialorder %v143_v31, %v149_v39 }
  0xfa   :  { %v153_v44 = vsel %vm151_vm6, 2, %v152_v40  ;;  %v156_v45 = vsel %vm151_vm6, %v143_v31, %v149_v39  ;;  %v158_v46 = vsel %vm147_vm5, 2, %v154_v41  ;;  %v159_v47 = vsel %vm147_vm5, %v143_v31, %v145_v38 }
  0xfb   :  { %v155_v48 = vsel %vm147_vm5, %v154_v41, %v153_v44  ;;  %v157_v49 = vsel %vm147_vm5, %v145_v38, %v156_v45  ;;  %v169_v50 = vrot.slane %v159_v47, 7  ;;  %v178_v51 = vrot.slane %v158_v46, 7 }
  0xfc   :  { %v173_v52 = vrot.slane %v157_v49, 7  ;;  %v176_v53 = vrot.slane %v155_v48, 7 }
  0xfd   :  { %vm171_vm7 = vcmp.gt.f32.partialorder %v167_v42, %v169_v50 }
  0xfe   :  { %vm175_vm8 = vcmp.gt.f32.partialorder %v167_v42, %v173_v52  ;;  %v182_v54 = vsel %vm171_vm7, 3, %v178_v51  ;;  %v183_v55 = vsel %vm171_vm7, %v167_v42, %v169_v50 }
  0xff   :  { %v177_v57 = vsel %vm175_vm8, 3, %v176_v53  ;;  %v180_v58 = vsel %vm175_vm8, %v167_v42, %v173_v52  ;;  %v193_v59 = vrot.slane %v183_v55, 7  ;;  %v202_v60 = vrot.slane %v182_v54, 7 }
 0x100   :  { %v179_v61 = vsel %vm171_vm7, %v178_v51, %v177_v57  ;;  %v181_v62 = vsel %vm171_vm7, %v169_v50, %v180_v58 }
 0x101   :  { %vm195_vm10 = vcmp.gt.f32.partialorder %v191_v56, %v193_v59  ;;  %v197_v63 = vrot.slane %v181_v62, 7  ;;  %v200_v0 = vrot.slane %v179_v61, 7 }
 0x102   :  { %v206_v1 = vsel %vm195_vm10, 4, %v202_v60  ;;  %v207_v2 = vsel %vm195_vm10, %v191_v56, %v193_v59 }
 0x103   :  { %vm199_vm11 = vcmp.gt.f32.partialorder %v191_v56, %v197_v63  ;;  %241 = vst.msk [vmem:[#allocation6 - $0x4] sm:$0x10] %vm219_vm9, %v207_v2  ;;  %244 = vst.msk [vmem:[#allocation6 - $0x2] sm:$0x10] %vm219_vm9, %v206_v1 }
 0x104   :  { %v201_v3 = vsel %vm199_vm11, 4, %v200_v0  ;;  %v204_v4 = vsel %vm199_vm11, %v191_v56, %v197_v63 }
 0x105   :  { %v203_v5 = vsel %vm195_vm10, %v202_v60, %v201_v3  ;;  %v205_v6 = vsel %vm195_vm10, %v193_v59, %v204_v4 }
 0x106   :  { %v208_v7 = vsub.f32 %v205_v6, %v207_v2  ;;  %242 = vst.msk [vmem:[#allocation6 - $0x3] sm:$0x10] %vm219_vm9, %v205_v6  ;;  %246 = vst.msk [vmem:[#allocation6 - $0x1] sm:$0x10] %vm219_vm9, %v203_v5 }
 0x107   :  { %334 = shalt.err (!%p331_p9)
}
 0x108   :  { %s335_s22 = scalar_lea.hbm %s481_s5, 64 }
 0x109   :  { %p336_p10 = scmp.ne.s32.totalorder %s481_s5, %s335_s22  ;;  %p339_p11 = scmp.lt.u32.totalorder %s335_s22, %s481_s5 }
 0x10b   :  { %p341_p12 = pnand %p339_p11, %p336_p10 }
 0x10d   :  { %344 = shalt.err (!%p341_p12)
}
 0x10e   :  { %266 = dma.vmem_to_hbm [thread:$0]  %s264_s18, 64, %s481_s5, [#allocation7]   ;;  %v209_v8 = vmul.f32 1.442695, %v208_v7  ;;  %vm215_vm12 = vcmp.eq.s32.totalorder %v206_v1, 0  ;;  %vm216_vm13 = vcmp.eq.s32.totalorder %v203_v5, 0 }
 0x10f   :  { %vm221_vm14 = vcmp.eq.s32.totalorder %v206_v1, 1  ;;  %vm226_vm15 = vcmp.eq.s32.totalorder %v206_v1, 2  ;;  %vm222_vm0 = vcmp.eq.s32.totalorder %v203_v5, 1  ;;  %vm227_vm1 = vcmp.eq.s32.totalorder %v203_v5, 2  ;;  %s379_s28 = smov [#allocation4]  }
 0x110   :  { %307 = vpow2.f32 %v209_v8  ;;  %vm232_vm2 = vcmp.eq.s32.totalorder %v203_v5, 3  ;;  %vm237_vm3 = vcmp.eq.s32.totalorder %v203_v5, 4  ;;  %s253_s29 = sshll.u32 %s379_s28, 4  ;;  %vm231_vm4 = vcmp.eq.s32.totalorder %v206_v1, 3  ;;  %s254_s29 = int_to_ptr.vmem [resolvable:$true] %s253_s29 }
 0x111   :  { %vm236_vm5 = vcmp.eq.s32.totalorder %v206_v1, 4  ;;  %s345_s5 = scalar_lea.vmem %s254_s29, 128  ;;  %p350_p0 = scmp.lt.s32.totalorder %s254_s29, %s254_s29 }
 0x112   :  { %p346_p13 = scmp.ne.s32.totalorder %s254_s29, %s345_s5  ;;  %p351_p1 = scmp.lt.s32.totalorder %s345_s5, %s345_s5 }
 0x114   :  { %p352_p2 = por %p351_p1, %p350_p0 }
 0x116   :  { %p353_p3 = pnand %p352_p2, %p346_p13 }
 0x11a   :  { %v308_v9 = vpop.eup %307 }
 0x11b   :  { %v211_v10 = vadd.f32 1.0, %v308_v9 }
 0x11d   :  { %309 = vrcp.f32 %v211_v10 }
 0x127   :  { %v310_v11 = vpop.eup %309 }
 0x128   :  { %v213_v12 = vmul.f32 %v310_v11, %v308_v9 }
 0x12a   :  { %v214_v13 = vsub.f32 1.0, %v213_v12  ;;  %v217_v14 = vsel %vm216_vm13, %v213_v12, 0.0  ;;  %v223_v15 = vsel %vm222_vm0, %v213_v12, 0.0  ;;  %v228_v16 = vsel %vm227_vm1, %v213_v12, 0.0 }
 0x12b   :  { %v233_v17 = vsel %vm232_vm2, %v213_v12, 0.0  ;;  %v238_v18 = vsel %vm237_vm3, %v213_v12, 0.0 }
 0x12c   :  { %v218_v19 = vsel %vm215_vm12, %v214_v13, %v217_v14  ;;  %v224_v20 = vsel %vm221_vm14, %v214_v13, %v223_v15  ;;  %v229_v21 = vsel %vm226_vm15, %v214_v13, %v228_v16  ;;  %v234_v22 = vsel %vm231_vm4, %v214_v13, %v233_v17 }
 0x12d   :  { %220 = vst.msk [vmem:[#allocation4 - $0x4] sm:$0x10] %vm219_vm9, %v218_v19  ;;  %225 = vst.msk [vmem:[#allocation4 - $0x3] sm:$0x10] %vm219_vm9, %v224_v20  ;;  %v239_v23 = vsel %vm236_vm5, %v214_v13, %v238_v18 }
 0x12e   :  { %230 = vst.msk [vmem:[#allocation4 - $0x2] sm:$0x10] %vm219_vm9, %v229_v21  ;;  %235 = vst.msk [vmem:[#allocation4 - $0x1] sm:$0x10] %vm219_vm9, %v234_v22 }
 0x12f   :  { %240 = vst.msk [vmem:[#allocation4] sm:$0x10] %vm219_vm9, %v239_v23 }
 0x130   :  { %356 = shalt.err (!%p353_p3)
}
 0x131   :  { %s357_s7 = scalar_lea.hbm %s480_s4, 128 }
 0x132   :  { %p358_p4 = scmp.ne.s32.totalorder %s480_s4, %s357_s7  ;;  %p361_p5 = scmp.lt.u32.totalorder %s357_s7, %s480_s4 }
 0x134   :  { %p363_p6 = pnand %p361_p5, %p358_p4 }
 0x136   :  { %366 = shalt.err (!%p363_p6)
}
 0x137   :  { %256 = dma.vmem_to_hbm [thread:$0]  %s254_s29, 128, %s480_s4, [#allocation5]  }
 0x138   :  { %369 = dma.done.wait [#allocation5], 128  }
 0x139   :  { %370 = vsyncadd [#allocation5], 4294967168 }
 0x13a   :  { %371 = dma.done.wait [#allocation7], 64  }
 0x13b   :  { %372 = vsyncadd [#allocation7], 4294967232 }
 0x13c   :  { %273 = vsyncpa [#allocation5], 1 }
 0x13d   :  { %274 = vsyncpa [#allocation7], 1 }

</bundles_post_ra>
